<compile_context>
chip_gen: v7x
topology: tpu7x:2x2x1
jax: 0.10.0
libtpu: 0.0.40
codegen_flags: <defaults>
</compile_context>

<pallas_src>
import functools

import jax
import jax.numpy as jnp
from jax import lax
from jax.experimental import pallas as pl
from jax.experimental.pallas import tpu as pltpu


def _round_up(x: int, m: int) -> int:
    return ((x + m - 1) // m) * m


def _sublane_pack(dtype) -> int:
    # 32-bit -> 8 rows/vreg, 16-bit -> 16, 8-bit -> 32.
    return max(8, 32 // jnp.dtype(dtype).itemsize)


def _pick_vmem_limit(tm: int, tn: int, tk: int, in_dtype, out_dtype) -> int:
    """Generation-aware VMEM budget with a sanity check against the tile sizes."""
    try:
        cap = int(pltpu.get_tpu_info().vmem_capacity_bytes)
    except Exception:
        cap = 128 * 1024 * 1024
    # v7x: 64 MiB per TensorCore -> leave headroom; v5e/v6e: 128 MiB.
    limit = 48 * 1024 * 1024 if cap <= 64 * 1024 * 1024 else 96 * 1024 * 1024
    in_b = jnp.dtype(in_dtype).itemsize
    out_b = jnp.dtype(out_dtype).itemsize
    # Double-buffered inputs (x, W^T, bias) + f32 acc + double-buffered output,
    # x2 slack for compiler internals + 4 MiB margin.
    need = (2 * (tm * tk + tk * tn + tn) * in_b
            + tm * tn * 4 + 2 * tm * tn * out_b) * 2 + (4 << 20)
    return int(min(max(limit, need), cap))


def _linear_kernel(x_ref, wt_ref, b_ref, o_ref, acc_ref, *, precision):
    # x_ref:   (tm, tk)   activation tile
    # wt_ref:  (tk, tn)   weight tile, already transposed to (in, out)
    # b_ref:   (1, tn)    bias tile (f32)
    # o_ref:   (tm, tn)   output tile
    # acc_ref: (tm, tn)   f32 accumulator scratch, resident across K steps
    k = pl.program_id(2)

    @pl.when(k == 0)
    def _init():
        # Fold bias into the accumulator init: removes a (tm, tn) VPU add and a
        # separate zeros store from the epilogue.
        acc_ref[...] = jnp.broadcast_to(
            b_ref[...].astype(jnp.float32), acc_ref.shape)

    acc_ref[...] += jnp.dot(
        x_ref[...], wt_ref[...],
        preferred_element_type=jnp.float32,
        precision=precision,
    )

    @pl.when(k == pl.num_programs(2) - 1)
    def _epilogue():
        o_ref[...] = acc_ref[...].astype(o_ref.dtype)


def prepare_linear_params(weight, bias, *, tile_n=512, tile_k=512,
                          compute_dtype=None):
    """One-time per-layer transform (cache the result in a real module so the
    weight pad/transpose is not a per-forward HBM round trip):
      - transpose W from PyTorch (out, in) layout to (in, out),
      - pad to tile-aligned, lane-dense shapes,
      - cast to the compute dtype (e.g. bf16) while bias stays f32.
    Returns (wt_padded, bias2d_padded, meta)."""
    N, K = weight.shape
    assert bias.shape == (N,), "bias shape mismatch"
    cdt = jnp.dtype(compute_dtype) if compute_dtype is not None else jnp.dtype(weight.dtype)

    tn = min(tile_n, _round_up(N, 128))
    tk = min(tile_k, _round_up(K, 128))
    Np = _round_up(N, tn)
    Kp = _round_up(K, tk)

    wt = weight.T  # (K, N): removes any per-K-tile trans_b transpose in-kernel
    if (Kp, Np) != (K, N):
        wt = jnp.pad(wt, ((0, Kp - K), (0, Np - N)))
    wt = wt.astype(cdt)

    b2d = bias.reshape(1, N).astype(jnp.float32)
    if Np != N:
        b2d = jnp.pad(b2d, ((0, 0), (0, Np - N)))

    return wt, b2d, (N, K, tn, tk)


def linear_forward(x, wt, b2d, meta, *, tile_m=512, precision=None):
    """Tiled (M, N, K) matmul with K-last reduction and f32 VMEM accumulator."""
    N, K, tn, tk = meta
    B, Kx = x.shape
    assert Kx == K, "in_features mismatch"
    Kp, Np = wt.shape
    out_dtype = x.dtype
    cdt = wt.dtype

    if x.dtype != cdt:
        x = x.astype(cdt)

    pack = _sublane_pack(cdt)
    tm = min(tile_m, _round_up(B, pack))
    Bp = _round_up(B, tm)
    if (Bp, Kp) != (B, K):
        x = jnp.pad(x, ((0, Bp - B), (0, Kp - K)))

    if precision is None:
        # Exact f32 matmul when operands are f32 (review correctness concern);
        # bf16 path keeps the fast native MXU route.
        precision = (lax.Precision.HIGHEST if cdt == jnp.dtype(jnp.float32)
                     else lax.Precision.DEFAULT)

    grid = (Bp // tm, Np // tn, Kp // tk)

    cost = pl.CostEstimate(
        flops=2 * B * N * K,
        transcendentals=0,
        bytes_accessed=((B * K + K * N) * jnp.dtype(cdt).itemsize
                        + N * 4
                        + B * N * jnp.dtype(out_dtype).itemsize),
    )

    kernel = functools.partial(_linear_kernel, precision=precision)

    out = pl.pallas_call(
        kernel,
        out_shape=jax.ShapeDtypeStruct((Bp, Np), out_dtype),
        grid_spec=pltpu.PrefetchScalarGridSpec(
            num_scalar_prefetch=0,
            grid=grid,
            in_specs=[
                pl.BlockSpec((tm, tk), lambda i, j, k: (i, k)),   # x
                pl.BlockSpec((tk, tn), lambda i, j, k: (k, j)),   # W^T (in, out)
                pl.BlockSpec((1, tn), lambda i, j, k: (0, j)),    # bias
            ],
            out_specs=pl.BlockSpec((tm, tn), lambda i, j, k: (i, j)),
            scratch_shapes=[pltpu.VMEM((tm, tn), jnp.float32)],
        ),
        compiler_params=pltpu.CompilerParams(
            dimension_semantics=("parallel", "parallel", "arbitrary"),
            vmem_limit_bytes=_pick_vmem_limit(tm, tn, tk, cdt, out_dtype),
        ),
        cost_estimate=cost,
    )(x, wt, b2d)

    # Slice padding away (no-op when already aligned).
    return out[:B, :N]


def my_linear(x, weight, bias, *, tile_m=512, tile_n=512, tile_k=512,
              compute_dtype=None, precision=None):
    """Pallas TPU equivalent of MyLinear.forward.

    x:      (B, in_features)
    weight: (out_features, in_features)   -- PyTorch convention, NOT transposed
    bias:   (out_features,)
    returns (B, out_features), dtype of x.
    """
    # TODO(synk): in a real module, call prepare_linear_params() once at param
    # setup and reuse (wt, b2d, meta) across forward calls.
    wt, b2d, meta = prepare_linear_params(
        weight, bias, tile_n=tile_n, tile_k=tile_k, compute_dtype=compute_dtype)
    return linear_forward(x, wt, b2d, meta, tile_m=tile_m, precision=precision)


if __name__ == "__main__":
    key = jax.random.PRNGKey(0)
    k_x, k_w, k_b = jax.random.split(key, 3)

    batch = 16
    in_features = 32
    out_features = 32
    dtype = jnp.float32

    # Deterministic "parameters" mirroring torch.nn.init.uniform_ (U[0,1)).
    weight = jax.random.uniform(k_w, (out_features, in_features), dtype=dtype)
    bias = jax.random.uniform(k_b, (out_features,), dtype=dtype)
    x = jax.random.normal(k_x, (batch, in_features), dtype=dtype)

    linear_fn = jax.jit(my_linear)
    out = jax.block_until_ready(linear_fn(x, weight, bias))

    # Reference check against plain JAX (x @ W^T + b).
    ref = x @ weight.T + bias
    assert out.shape == (batch, out_features)
    assert out.dtype == x.dtype
    assert jnp.allclose(out, ref, atol=1e-5, rtol=1e-5)

    print("KERNEL_OK")
</pallas_src>

<mosaic_0001>
module attributes {stable_mosaic.version = 11 : i64} {
  func.func @_linear_kernel(%arg0: i32, %arg1: i32, %arg2: i32, %arg3: memref<16x128xf32, #tpu.memory_space<vmem>>, %arg4: memref<128x128xf32, #tpu.memory_space<vmem>>, %arg5: memref<1x128xf32, #tpu.memory_space<vmem>>, %arg6: memref<16x128xf32, #tpu.memory_space<vmem>>, %arg7: memref<16x128xf32, #tpu.memory_space<vmem>>) attributes {dimension_semantics = [#tpu.dimension_semantics<parallel>, #tpu.dimension_semantics<parallel>, #tpu.dimension_semantics<arbitrary>], iteration_bounds = array<i64: 1, 1, 1>, scalar_prefetch = 0 : i64, scratch_operands = 1 : i64, tpu.core_type = #tpu.core_type<tc>, window_params = [{transform_indices = @transform_0, window_bounds = array<i64: 16, 128>}, {transform_indices = @transform_1, window_bounds = array<i64: 128, 128>}, {transform_indices = @transform_2, window_bounds = array<i64: 1, 128>}, {transform_indices = @transform_3, window_bounds = array<i64: 16, 128>}]} {
    %c0_i32 = arith.constant 0 : i32
    %0 = arith.cmpi eq, %arg2, %c0_i32 : i32
    %1 = arith.extui %0 : i1 to i32
    %c0_i32_0 = arith.constant 0 : i32
    %2 = arith.cmpi ne, %1, %c0_i32_0 : i32
    scf.if %2 {
      %c0_10 = arith.constant 0 : index
      %c0_11 = arith.constant 0 : index
      %12 = vector.load %arg5[%c0_10, %c0_11] : memref<1x128xf32, #tpu.memory_space<vmem>>, vector<1x128xf32>
      %13 = vector.shape_cast %12 : vector<1x128xf32> to vector<1x128xf32>
      %14 = vector.broadcast %13 : vector<1x128xf32> to vector<16x128xf32>
      %c0_12 = arith.constant 0 : index
      %c0_13 = arith.constant 0 : index
      %15 = vector.load %arg7[%c0_12, %c0_13] : memref<16x128xf32, #tpu.memory_space<vmem>>, vector<16x128xf32>
      tpu.vector_store %arg7[%c0_12, %c0_13], %14 {strides = array<i32>} : memref<16x128xf32, #tpu.memory_space<vmem>>, vector<16x128xf32>,
    } else {
    }
    %c0 = arith.constant 0 : index
    %c0_1 = arith.constant 0 : index
    %3 = vector.load %arg7[%c0, %c0_1] : memref<16x128xf32, #tpu.memory_space<vmem>>, vector<16x128xf32>
    %c0_2 = arith.constant 0 : index
    %c0_3 = arith.constant 0 : index
    %4 = vector.load %arg3[%c0_2, %c0_3] : memref<16x128xf32, #tpu.memory_space<vmem>>, vector<16x128xf32>
    %c0_4 = arith.constant 0 : index
    %c0_5 = arith.constant 0 : index
    %5 = vector.load %arg4[%c0_4, %c0_5] : memref<128x128xf32, #tpu.memory_space<vmem>>, vector<128x128xf32>
    %cst = arith.constant dense<0.000000e+00> : vector<16x128xf32>
    %6 = tpu.matmul %4, %5, %cst {dimension_numbers = #tpu.dot_dimension_numbers<[1], [0], [0], [1], [0, 0, 1, 1], [], []>, precision = #tpu.contract_precision<fp32>} : vector<16x128xf32>, vector<128x128xf32>, vector<16x128xf32> -> vector<16x128xf32>
    %7 = arith.addf %3, %6 : vector<16x128xf32>
    %c0_6 = arith.constant 0 : index
    %c0_7 = arith.constant 0 : index
    %8 = vector.load %arg7[%c0_6, %c0_7] : memref<16x128xf32, #tpu.memory_space<vmem>>, vector<16x128xf32>
    tpu.vector_store %arg7[%c0_6, %c0_7], %7 {strides = array<i32>} : memref<16x128xf32, #tpu.memory_space<vmem>>, vector<16x128xf32>,
    %c0_i32_8 = arith.constant 0 : i32
    %9 = arith.cmpi eq, %arg2, %c0_i32_8 : i32
    %10 = arith.extui %9 : i1 to i32
    %c0_i32_9 = arith.constant 0 : i32
    %11 = arith.cmpi ne, %10, %c0_i32_9 : i32
    scf.if %11 {
      %c0_10 = arith.constant 0 : index
      %c0_11 = arith.constant 0 : index
      %12 = vector.load %arg7[%c0_10, %c0_11] : memref<16x128xf32, #tpu.memory_space<vmem>>, vector<16x128xf32>
      %c0_12 = arith.constant 0 : index
      %c0_13 = arith.constant 0 : index
      %13 = vector.load %arg6[%c0_12, %c0_13] : memref<16x128xf32, #tpu.memory_space<vmem>>, vector<16x128xf32>
      tpu.vector_store %arg6[%c0_12, %c0_13], %12 {strides = array<i32>} : memref<16x128xf32, #tpu.memory_space<vmem>>, vector<16x128xf32>,
    } else {
    }
    return
  }
  func.func @transform_0(%arg0: i32, %arg1: i32, %arg2: i32) -> (i32, i32) {
    %c0_i32 = arith.constant 0 : i32
    return %arg0, %arg2 : i32, i32
  }
  func.func @transform_1(%arg0: i32, %arg1: i32, %arg2: i32) -> (i32, i32) {
    %c0_i32 = arith.constant 0 : i32
    return %arg2, %arg1 : i32, i32
  }
  func.func @transform_2(%arg0: i32, %arg1: i32, %arg2: i32) -> (i32, i32) {
    %c0_i32 = arith.constant 0 : i32
    %c0_i32_0 = arith.constant 0 : i32
    return %c0_i32, %arg1 : i32, i32
  }
  func.func @transform_3(%arg0: i32, %arg1: i32, %arg2: i32) -> (i32, i32) {
    %c0_i32 = arith.constant 0 : i32
    return %arg0, %arg1 : i32, i32
  }
}

</mosaic_0001>

<bundles_post_ra>
// kernel: my_linear.1
= control target key start
LH: loop header
LB: loop body
LE: loop exit
PB: predicated region body
PF: predicated region fallthrough
CT: control target
= control target key end

     0   :  { %8 = vsyncpa [#allocation4], 0  ;;  %s1777_s0 = inlined_call_operand.hbm [shape: f32[16,128], index: 0, kind: input, shape index: {}]   ;;  %s1778_s1 = inlined_call_operand.hbm [shape: f32[128,128], index: 1, kind: input, shape index: {}]   ;;  %s1779_s2 = inlined_call_operand.hbm [shape: f32[1,128], index: 2, kind: input, shape index: {}]   ;;  %s1780_s3 = inlined_call_operand.hbm [shape: f32[16,128], index: 3, kind: output, shape index: {}]  }
   0x1   :  { %9 = vsyncpa [#allocation7], 0 }
   0x2   :  { %10 = vsyncpa [#allocation5], 0  ;;  %s1421_s12 = smov [#allocation6]   ;;  %s1422_s14 = smov [#allocation3]  }
   0x3   :  { %s28_s13 = sshll.u32 %s1421_s12, 4  ;;  %s16_s15 = sshll.u32 %s1422_s14, 4  ;;  %s29_s13 = int_to_ptr.vmem [resolvable:$true] %s28_s13  ;;  %s1447_s15 = int_to_ptr.vmem [resolvable:$true] %s16_s15 }
   0x4   :  { %s1327_s18 = scalar_lea.hbm %s1778_s1, 2048 }
   0x5   :  { %p1328_p0 = scmp.ne.s32.totalorder %s1778_s1, %s1327_s18  ;;  %p1331_p1 = scmp.lt.u32.totalorder %s1327_s18, %s1778_s1 }
   0x7   :  { %p1333_p2 = pnand %p1331_p1, %p1328_p0 }
   0x9   :  { %1336 = shalt.err (!%p1333_p2)
}
   0xa   :  { %s1337_s23 = scalar_lea.vmem %s29_s13, 2048  ;;  %p1342_p4 = scmp.lt.s32.totalorder %s29_s13, %s29_s13 }
   0xb   :  { %p1338_p3 = scmp.ne.s32.totalorder %s29_s13, %s1337_s23  ;;  %p1343_p5 = scmp.lt.s32.totalorder %s1337_s23, %s1337_s23 }
   0xd   :  { %p1344_p6 = por %p1343_p5, %p1342_p4 }
   0xf   :  { %p1345_p7 = pnand %p1344_p6, %p1338_p3 }
  0x11   :  { %1348 = shalt.err (!%p1345_p7)
}
  0x12   :  { %s1423_s24 = smov 128   ;;  %s1424_s25 = smov 8  }
  0x13   :  { %34 = dma.hbm_to_vmem [thread:$0]  %s1778_s1, 2048, %s29_s13, [#allocation7], %s1423_s24, %s1423_s24, %s1424_s25  }
  0x14   :  { %s1349_s30 = scalar_lea.hbm %s1777_s0, 256 }
  0x15   :  { %p1350_p8 = scmp.ne.s32.totalorder %s1777_s0, %s1349_s30  ;;  %p1353_p9 = scmp.lt.u32.totalorder %s1349_s30, %s1777_s0 }
  0x17   :  { %p1355_p10 = pnand %p1353_p9, %p1350_p8 }
  0x19   :  { %1358 = shalt.err (!%p1355_p10)
}
  0x1a   :  { %s1359_s8 = scalar_lea.vmem %s1447_s15, 256  ;;  %p1364_p12 = scmp.lt.s32.totalorder %s1447_s15, %s1447_s15 }
  0x1b   :  { %p1360_p11 = scmp.ne.s32.totalorder %s1447_s15, %s1359_s8  ;;  %p1365_p13 = scmp.lt.s32.totalorder %s1359_s8, %s1359_s8 }
  0x1d   :  { %p1366_p0 = por %p1365_p13, %p1364_p12 }
  0x1f   :  { %p1367_p1 = pnand %p1366_p0, %p1360_p11 }
  0x21   :  { %1370 = shalt.err (!%p1367_p1)
}
  0x22   :  { %22 = dma.hbm_to_vmem [thread:$0]  %s1777_s0, 256, %s1447_s15, [#allocation4], %s1423_s24, %s1423_s24, %s1424_s25  }
  0x23   :  { %s1425_s10 = smov [#allocation8]   ;;  %s1371_s14 = scalar_lea.hbm %s1779_s2, 16 }
  0x24   :  { %s41_s11 = sshll.u32 %s1425_s10, 4  ;;  %p1372_p2 = scmp.ne.s32.totalorder %s1779_s2, %s1371_s14  ;;  %s42_s11 = int_to_ptr.vmem [resolvable:$true] %s41_s11 }
  0x25   :  { %p1375_p3 = scmp.lt.u32.totalorder %s1371_s14, %s1779_s2 }
  0x27   :  { %p1377_p4 = pnand %p1375_p3, %p1372_p2 }
  0x29   :  { %1380 = shalt.err (!%p1377_p4)
}
  0x2a   :  { %s1381_s20 = scalar_lea.vmem %s42_s11, 16  ;;  %s1385_s0 = scalar_lea.vmem %s42_s11, 32 }
  0x2b   :  { %p1382_p5 = scmp.ne.s32.totalorder %s42_s11, %s1381_s20  ;;  %p1386_p6 = scmp.lt.s32.totalorder %s42_s11, %s42_s11 }
  0x2c   :  { %p1387_p7 = scmp.lt.s32.totalorder %s1385_s0, %s1381_s20 }
  0x2e   :  { %p1388_p8 = por %p1387_p7, %p1386_p6 }
  0x30   :  { %p1389_p9 = pnand %p1388_p8, %p1382_p5 }
  0x32   :  { %1392 = shalt.err (!%p1389_p9)
}
  0x33   :  { %44 = dma.hbm_to_vmem [thread:$0]  %s1779_s2, 16, %s42_s11, [#allocation7]  }
  0x34   :  { %1415 = dma.done.wait [#allocation4], 256  }
  0x35   :  { %1416 = vsyncadd [#allocation4], 4294967040 }
  0x36   :  { %1417 = dma.done.wait [#allocation7], 2064  }
  0x37   :  { %1418 = vsyncadd [#allocation7], 4294965232  ;;  %v71_v0 = vld [vmem:[#allocation6] sm:$0xff]  ;;  %v72_v1 = vld [vmem:[#allocation6 + $0x8] sm:$0xff]  ;;  %s1426_s2 = smov [#allocation9]  }
  0x38   :  { %v73_v2 = vld [vmem:[#allocation6 + $0x10] sm:$0xff]  ;;  %v88_v3 = vand.u32 4294901760, %v71_v0  ;;  %v91_v4 = vand.u32 4294901760, %v72_v1  ;;  %v1496_v5 = vld [vmem:[#allocation6 + $0x18] sm:$0xff]  ;;  %v1498_v7 = vld [vmem:[#allocation6 + $0x20] sm:$0xff]  ;;  %s787_s22 = sshll.u32 %s1426_s2, 4  ;;  %s788_s22 = int_to_ptr.vmem [resolvable:$true] %s787_s22 }
  0x39   :  { %v94_v6 = vand.u32 4294901760, %v73_v2  ;;  %v1500_v8 = vld [vmem:[#allocation6 + $0x28] sm:$0xff]  ;;  %v97_v9 = vand.u32 4294901760, %v1496_v5  ;;  %v100_v11 = vand.u32 4294901760, %v1498_v7  ;;  %v1509_v14 = vld [vmem:[#allocation6 + $0x30] sm:$0xff]  ;;  %v1511_v15 = vld [vmem:[#allocation6 + $0x38] sm:$0xff]  ;;  %p1398_p11 = scmp.lt.s32.totalorder %s788_s22, %s788_s22 }
  0x3a   :  { %v1503_v10 = vpack.c.bf16 %v91_v4, %v88_v3  ;;  %v103_v12 = vand.u32 4294901760, %v1500_v8  ;;  %v69_v16 = vld [vmem:[#allocation3] sm:$0xff]  ;;  %v106_v19 = vand.u32 4294901760, %v1509_v14  ;;  %v109_v20 = vand.u32 4294901760, %v1511_v15  ;;  %v1529_v21 = vld [vmem:[#allocation6 + $0x40] sm:$0xff]  ;;  %v1531_v22 = vld [vmem:[#allocation6 + $0x48] sm:$0xff] }
  0x3b   :  { %v1507_v13 = vpack.c.bf16 %v97_v9, %v94_v6  ;;  %v1517_v17 = vand.u32 4294901760, %v69_v16  ;;  %v112_v26 = vand.u32 4294901760, %v1529_v21  ;;  %v115_v27 = vand.u32 4294901760, %v1531_v22  ;;  %v1549_v28 = vld [vmem:[#allocation6 + $0x50] sm:$0xff]  ;;  %v1551_v29 = vld [vmem:[#allocation6 + $0x58] sm:$0xff]  ;;  %v1566_v36 = vld [vmem:[#allocation6 + $0x60] sm:$0xff] }
  0x3c   :  { %1120 = vmatprep.subr.bf16.mxu1 %v1503_v10  ;;  %1216 = vmatprep.subr.bf16.mxu0 %v1503_v10  ;;  %v1525_v18 = vpack.c.bf16 %v103_v12, %v100_v11  ;;  %v1545_v25 = vpack.c.bf16 %v109_v20, %v106_v19  ;;  %v118_v31 = vand.u32 4294901760, %v1549_v28  ;;  %v70_v33 = vld [vmem:[#allocation3 + $0x8] sm:$0xff]  ;;  %v121_v35 = vand.u32 4294901760, %v1551_v29  ;;  %v1568_v37 = vld [vmem:[#allocation6 + $0x68] sm:$0xff]  ;;  %v1580_v43 = vld [vmem:[#allocation6 + $0x70] sm:$0xff]  ;;  %s1393_s23 = scalar_lea.vmem %s788_s22, 256 }
  0x3d   :  { %1122 = vmatpush3.bf16.msra.mxu1 %v1503_v10  ;;  %1218 = vmatpush3.bf16.msra.mxu0 %v1503_v10  ;;  %v1534_v23 = vsub.f32 %v69_v16, %v1517_v17  ;;  %v1563_v34 = vpack.c.bf16 %v115_v27, %v112_v26  ;;  %v1570_v38 = vsub.f32 %v71_v0, %v88_v3  ;;  %v1574_v40 = vand.u32 4294901760, %v70_v33  ;;  %v1582_v44 = vld [vmem:[#allocation6 + $0x78] sm:$0xff]  ;;  %p1394_p10 = scmp.ne.s32.totalorder %s788_s22, %s1393_s23  ;;  %p1399_p12 = scmp.lt.s32.totalorder %s1393_s23, %s1393_s23 }
  0x3e   :  { %1124 = vmatprep.subr.bf16.mxu1 %v1507_v13  ;;  %1220 = vmatprep.subr.bf16.mxu0 %v1507_v13  ;;  %v1572_v39 = vsub.f32 %v72_v1, %v91_v4  ;;  %v124_v41 = vand.u32 4294901760, %v1566_v36  ;;  %v127_v42 = vand.u32 4294901760, %v1568_v37  ;;  %v1584_v45 = vsub.f32 %v73_v2, %v94_v6 }
  0x3f   :  { %v170_v24 = vand.u32 4294901760, %v1534_v23  ;;  %v1592_v46 = vpack.c.bf16 %v121_v35, %v118_v31  ;;  %v191_v47 = vand.u32 4294901760, %v1570_v38  ;;  %v1597_v49 = vsub.f32 %v1496_v5, %v97_v9  ;;  %p1400_p13 = por %p1399_p12, %p1398_p11 }
  0x40   :  { %v198_v48 = vand.u32 4294901760, %v1572_v39  ;;  %v130_v50 = vand.u32 4294901760, %v1580_v43  ;;  %v133_v51 = vand.u32 4294901760, %v1582_v44  ;;  %v1602_v52 = vsub.f32 %v70_v33, %v1574_v40 }
  0x41   :  { %1126 = vmatpush3.bf16.msra.mxu1 %v1507_v13  ;;  %1222 = vmatpush3.bf16.msra.mxu0 %v1507_v13  ;;  %v171_v30 = vsub.f32 %v1534_v23, %v170_v24  ;;  %v1610_v53 = vpack.c.bf16 %v127_v42, %v124_v41  ;;  %v205_v54 = vand.u32 4294901760, %v1584_v45  ;;  %v1616_v55 = vsub.f32 %v1498_v7, %v100_v11  ;;  %p1401_p0 = pnand %p1400_p13, %p1394_p10 }
  0x42   :  { %1128 = vmatprep.subr.bf16.mxu1 %v1525_v18  ;;  %1224 = vmatprep.subr.bf16.mxu0 %v1525_v18  ;;  %v192_v56 = vsub.f32 %v1570_v38, %v191_v47  ;;  %v199_v57 = vsub.f32 %v1572_v39, %v198_v48  ;;  %v212_v58 = vand.u32 4294901760, %v1597_v49  ;;  %v1626_v59 = vsub.f32 %v1500_v8, %v103_v12 }
  0x43   :  { %1046 = vmatprep.mubr.f32.mxu0 %v170_v24  ;;  %v172_v32 = vand.u32 4294901760, %v171_v30  ;;  %v1632_v60 = vpack.c.bf16 %v133_v51, %v130_v50  ;;  %v180_v61 = vand.u32 4294901760, %v1602_v52  ;;  %v206_v62 = vsub.f32 %v1584_v45, %v205_v54 }
  0x44   :  { %v219_v63 = vand.u32 4294901760, %v1616_v55  ;;  %v1642_v0 = vsub.f32 %v1509_v14, %v106_v19  ;;  %v1647_v1 = vsub.f32 %v1511_v15, %v109_v20  ;;  %v193_v2 = vand.u32 4294901760, %v192_v56 }
  0x45   :  { %1130 = vmatpush3.bf16.msra.mxu1 %v1525_v18  ;;  %1226 = vmatpush3.bf16.msra.mxu0 %v1525_v18  ;;  %v200_v3 = vand.u32 4294901760, %v199_v57  ;;  %v213_v4 = vsub.f32 %v1597_v49, %v212_v58  ;;  %v226_v5 = vand.u32 4294901760, %v1626_v59  ;;  %v1247_v6 = vpack.c.bf16 %v198_v48, %v191_v47 }
  0x46   :  { %1132 = vmatprep.subr.bf16.mxu1 %v1545_v25  ;;  %1228 = vmatprep.subr.bf16.mxu0 %v1545_v25  ;;  %v181_v7 = vsub.f32 %v1602_v52, %v180_v61  ;;  %v1657_v8 = vsub.f32 %v1529_v21, %v112_v26  ;;  %v207_v9 = vand.u32 4294901760, %v206_v62  ;;  %v220_v11 = vsub.f32 %v1616_v55, %v219_v63 }
  0x47   :  { %941 = vmatprep.mubr.f32.mxu1 %v172_v32  ;;  %v233_v12 = vand.u32 4294901760, %v1642_v0  ;;  %v240_v14 = vand.u32 4294901760, %v1647_v1  ;;  %v1151_v15 = vpack.c.bf16 %v200_v3, %v193_v2  ;;  %v214_v16 = vand.u32 4294901760, %v213_v4 }
  0x48   :  { %v227_v19 = vsub.f32 %v1626_v59, %v226_v5  ;;  %v1670_v20 = vsub.f32 %v1531_v22, %v115_v27  ;;  %v182_v21 = vand.u32 4294901760, %v181_v7  ;;  %v1251_v24 = vpack.c.bf16 %v212_v58, %v205_v54 }
  0x49   :  { %1134 = vmatpush3.bf16.msra.mxu1 %v1545_v25  ;;  %1230 = vmatpush3.bf16.msra.mxu0 %v1545_v25  ;;  %v247_v26 = vand.u32 4294901760, %v1657_v8  ;;  %v1676_v30 = vsub.f32 %v1549_v28, %v118_v31  ;;  %v234_v32 = vsub.f32 %v1642_v0, %v233_v12  ;;  %v241_v33 = vsub.f32 %v1647_v1, %v240_v14 }
  0x4a   :  { %1136 = vmatprep.subr.bf16.mxu1 %v1563_v34  ;;  %1232 = vmatprep.subr.bf16.mxu0 %v1563_v34  ;;  %v1685_v22 = vsub.f32 %v1551_v29, %v121_v35  ;;  %v1155_v27 = vpack.c.bf16 %v214_v16, %v207_v9  ;;  %v221_v47 = vand.u32 4294901760, %v220_v11  ;;  %v228_v48 = vand.u32 4294901760, %v227_v19 }
  0x4b   :  { %v254_v28 = vand.u32 4294901760, %v1670_v20  ;;  %v1255_v31 = vpack.c.bf16 %v226_v5, %v219_v63  ;;  %v248_v54 = vsub.f32 %v1657_v8, %v247_v26  ;;  %v1692_v56 = vsub.f32 %v1566_v36, %v124_v41 }
  0x4c   :  { %v235_v29 = vand.u32 4294901760, %v234_v32  ;;  %v242_v35 = vand.u32 4294901760, %v241_v33  ;;  %v261_v57 = vand.u32 4294901760, %v1676_v30  ;;  %v268_v58 = vand.u32 4294901760, %v1685_v22 }
  0x4d   :  { %1138 = vmatpush3.bf16.msra.mxu1 %v1563_v34  ;;  %1234 = vmatpush3.bf16.msra.mxu0 %v1563_v34  ;;  %v1159_v62 = vpack.c.bf16 %v228_v48, %v221_v47  ;;  %v1700_v63 = vsub.f32 %v1568_v37, %v127_v42  ;;  %v1259_v36 = vpack.c.bf16 %v240_v14, %v233_v12  ;;  %v249_v41 = vand.u32 4294901760, %v248_v54 }
  0x4e   :  { %1140 = vmatprep.subr.bf16.mxu1 %v1592_v46  ;;  %1236 = vmatprep.subr.bf16.mxu0 %v1592_v46  ;;  %v1163_v2 = vpack.c.bf16 %v242_v35, %v235_v29  ;;  %v262_v3 = vsub.f32 %v1676_v30, %v261_v57  ;;  %v269_v4 = vsub.f32 %v1685_v22, %v268_v58  ;;  %v275_v5 = vand.u32 4294901760, %v1692_v56 }
  0x4f   :  { %v282_v37 = vand.u32 4294901760, %v1700_v63  ;;  %v1711_v42 = vsub.f32 %v1580_v43, %v130_v50  ;;  %v1716_v7 = vsub.f32 %v1582_v44, %v133_v51  ;;  %v1263_v9 = vpack.c.bf16 %v254_v28, %v247_v26 }
  0x50   :  { %v263_v11 = vand.u32 4294901760, %v262_v3  ;;  %v270_v12 = vand.u32 4294901760, %v269_v4  ;;  %v276_v14 = vsub.f32 %v1692_v56, %v275_v5  ;;  %v1267_v51 = vpack.c.bf16 %v268_v58, %v261_v57 }
  0x51   :  { %1142 = vmatpush3.bf16.msra.mxu1 %v1592_v46  ;;  %1238 = vmatpush3.bf16.msra.mxu0 %v1592_v46  ;;  %v283_v16 = vsub.f32 %v1700_v63, %v282_v37  ;;  %v289_v43 = vand.u32 4294901760, %v1711_v42  ;;  %v296_v50 = vand.u32 4294901760, %v1716_v7  ;;  %v1271_v33 = vpack.c.bf16 %v282_v37, %v275_v5 }
  0x52   :  { %1144 = vmatprep.subr.bf16.mxu1 %v1610_v53  ;;  %1240 = vmatprep.subr.bf16.mxu0 %v1610_v53  ;;  %v1171_v44 = vpack.c.bf16 %v270_v12, %v263_v11  ;;  %v277_v19 = vand.u32 4294901760, %v276_v14  ;;  %v1187_v54 = vpack.c.bf16 %v1597_v49, %v1584_v45 }
  0x53   :  { %v297_v26 = vsub.f32 %v1716_v7, %v296_v50 }
  0x55   :  { %1146 = vmatpush3.bf16.msra.mxu1 %v1610_v53  ;;  %1242 = vmatpush3.bf16.msra.mxu0 %v1610_v53  ;;  %v298_v47 = vand.u32 4294901760, %v297_v26 }
  0x56   :  { %1148 = vmatprep.subr.bf16.mxu1 %v1632_v60  ;;  %1244 = vmatprep.subr.bf16.mxu0 %v1632_v60 }
  0x59   :  { %1150 = vmatpush3.bf16.msra.mxu1 %v1632_v60  ;;  %1246 = vmatpush3.bf16.msra.mxu0 %v1632_v60 }
  0x5a   :  { %1152 = vmatprep.subr.bf16.mxu1 %v1151_v15  ;;  %1248 = vmatprep.subr.bf16.mxu0 %v1247_v6 }
  0x5c   :  { %942 = vmatmul.mubr.f32.vlgmr.msra.gmra.mrb[0].mxu1 %v182_v21  ;;  %1047 = vmatmul.mubr.f32.vlgmr.msra.gmra.mrb[0].mxu0 %v180_v61  ;;  %v255_v61 = vsub.f32 %v1670_v20, %v254_v28  ;;  %v284_v21 = vand.u32 4294901760, %v283_v16  ;;  %v1275_v28 = vpack.c.bf16 %v296_v50, %v289_v43 }
  0x5d   :  { %1154 = vmatpush3.bf16.msra.mxu1 %v1151_v15  ;;  %1250 = vmatpush3.bf16.msra.mxu0 %v1247_v6 }
  0x5e   :  { %1156 = vmatprep.subr.bf16.mxu1 %v1155_v27  ;;  %1252 = vmatprep.subr.bf16.mxu0 %v1251_v24  ;;  %v256_v6 = vand.u32 4294901760, %v255_v61  ;;  %v1175_v32 = vpack.c.bf16 %v284_v21, %v277_v19 }
  0x5f   :  { %976 = vmatprep.mubr.f32.mxu1 %v1517_v17  ;;  %1081 = vmatprep.mubr.f32.mxu0 %v1517_v17 }
  0x60   :  { %v1167_v15 = vpack.c.bf16 %v256_v6, %v249_v41 }
  0x61   :  { %1158 = vmatpush3.bf16.msra.mxu1 %v1155_v27  ;;  %1254 = vmatpush3.bf16.msra.mxu0 %v1251_v24  ;;  %v290_v24 = vsub.f32 %v1711_v42, %v289_v43 }
  0x62   :  { %1160 = vmatprep.subr.bf16.mxu1 %v1159_v62  ;;  %1256 = vmatprep.subr.bf16.mxu0 %v1255_v31 }
  0x63   :  { %v291_v27 = vand.u32 4294901760, %v290_v24 }
  0x65   :  { %1162 = vmatpush3.bf16.msra.mxu1 %v1159_v62  ;;  %1258 = vmatpush3.bf16.msra.mxu0 %v1255_v31  ;;  %v1179_v48 = vpack.c.bf16 %v298_v47, %v291_v27  ;;  %v1183_v31 = vpack.c.bf16 %v1572_v39, %v1570_v38  ;;  %v1191_v38 = vpack.c.bf16 %v1626_v59, %v1616_v55 }
  0x66   :  { %1164 = vmatprep.subr.bf16.mxu1 %v1163_v2  ;;  %1260 = vmatprep.subr.bf16.mxu0 %v1259_v36  ;;  %v1195_v39 = vpack.c.bf16 %v1647_v1, %v1642_v0 }
  0x69   :  { %1166 = vmatpush3.bf16.msra.mxu1 %v1163_v2  ;;  %1262 = vmatpush3.bf16.msra.mxu0 %v1259_v36 }
  0x6a   :  { %1168 = vmatprep.subr.bf16.mxu1 %v1167_v15  ;;  %1264 = vmatprep.subr.bf16.mxu0 %v1263_v9 }
  0x6d   :  { %1170 = vmatpush3.bf16.msra.mxu1 %v1167_v15  ;;  %1266 = vmatpush3.bf16.msra.mxu0 %v1263_v9 }
  0x6e   :  { %1172 = vmatprep.subr.bf16.mxu1 %v1171_v44  ;;  %1268 = vmatprep.subr.bf16.mxu0 %v1267_v51 }
  0x71   :  { %1174 = vmatpush3.bf16.msra.mxu1 %v1171_v44  ;;  %1270 = vmatpush3.bf16.msra.mxu0 %v1267_v51 }
  0x72   :  { %1176 = vmatprep.subr.bf16.mxu1 %v1175_v32  ;;  %1272 = vmatprep.subr.bf16.mxu0 %v1271_v33 }
  0x75   :  { %1178 = vmatpush3.bf16.msra.mxu1 %v1175_v32  ;;  %1274 = vmatpush3.bf16.msra.mxu0 %v1271_v33 }
  0x76   :  { %1180 = vmatprep.subr.bf16.mxu1 %v1179_v48  ;;  %1276 = vmatprep.subr.bf16.mxu0 %v1275_v28 }
  0x79   :  { %1182 = vmatpush3.bf16.msra.mxu1 %v1179_v48  ;;  %1278 = vmatpush3.bf16.msra.mxu0 %v1275_v28 }
  0x7a   :  { %1184 = vmatprep.subr.bf16.mxu1 %v1183_v31  ;;  %1280 = vmatprep.subr.bf16.mxu0 %v1503_v10 }
  0x7c   :  { %977 = vmatmul.mubr.f32.vlgmr.msra.gmra.mrb[0].mxu1 %v1574_v40  ;;  %1082 = vmatmul.mubr.f32.vlgmr.msra.gmra.mrb[0].mxu0 %v1574_v40 }
  0x7d   :  { %1186 = vmatpush3.bf16.msra.mxu1 %v1183_v31  ;;  %1282 = vmatpush3.bf16.msra.mxu0 %v1503_v10  ;;  %v1199_v10 = vpack.c.bf16 %v1670_v20, %v1657_v8 }
  0x7e   :  { %1188 = vmatprep.subr.bf16.mxu1 %v1187_v54  ;;  %1284 = vmatprep.subr.bf16.mxu0 %v1507_v13 }
  0x7f   :  { %1011 = vmatprep.mubr.f32.mxu1 %v1534_v23  ;;  %1116 = vmatprep.mubr.f32.mxu0 %v1517_v17  ;;  %v1207_v17 = vpack.c.bf16 %v1700_v63, %v1692_v56 }
  0x81   :  { %1190 = vmatpush3.bf16.msra.mxu1 %v1187_v54  ;;  %1286 = vmatpush3.bf16.msra.mxu0 %v1507_v13  ;;  %v1203_v13 = vpack.c.bf16 %v1685_v22, %v1676_v30 }
  0x82   :  { %1192 = vmatprep.subr.bf16.mxu1 %v1191_v38  ;;  %1288 = vmatprep.subr.bf16.mxu0 %v1525_v18 }
  0x85   :  { %1194 = vmatpush3.bf16.msra.mxu1 %v1191_v38  ;;  %1290 = vmatpush3.bf16.msra.mxu0 %v1525_v18  ;;  %v1211_v18 = vpack.c.bf16 %v1716_v7, %v1711_v42 }
  0x86   :  { %1196 = vmatprep.subr.bf16.mxu1 %v1195_v39  ;;  %1292 = vmatprep.subr.bf16.mxu0 %v1545_v25 }
  0x89   :  { %1198 = vmatpush3.bf16.msra.mxu1 %v1195_v39  ;;  %1294 = vmatpush3.bf16.msra.mxu0 %v1545_v25  ;;  %v800_v25 = vld [vmem:[#allocation8] ss:$0 sm:$0xff] }
  0x8a   :  { %1200 = vmatprep.subr.bf16.mxu1 %v1199_v10  ;;  %1296 = vmatprep.subr.bf16.mxu0 %v1563_v34 }
  0x8d   :  { %1202 = vmatpush3.bf16.msra.mxu1 %v1199_v10  ;;  %1298 = vmatpush3.bf16.msra.mxu0 %v1563_v34 }
  0x8e   :  { %1204 = vmatprep.subr.bf16.mxu1 %v1203_v13  ;;  %1300 = vmatprep.subr.bf16.mxu0 %v1592_v46 }
  0x91   :  { %1206 = vmatpush3.bf16.msra.mxu1 %v1203_v13  ;;  %1302 = vmatpush3.bf16.msra.mxu0 %v1592_v46 }
  0x92   :  { %1208 = vmatprep.subr.bf16.mxu1 %v1207_v17  ;;  %1304 = vmatprep.subr.bf16.mxu0 %v1610_v53 }
  0x95   :  { %1210 = vmatpush3.bf16.msra.mxu1 %v1207_v17  ;;  %1306 = vmatpush3.bf16.msra.mxu0 %v1610_v53 }
  0x96   :  { %1212 = vmatprep.subr.bf16.mxu1 %v1211_v18  ;;  %1308 = vmatprep.subr.bf16.mxu0 %v1632_v60 }
  0x99   :  { %1214 = vmatpush3.bf16.msra.mxu1 %v1211_v18  ;;  %1310 = vmatpush3.bf16.msra.mxu0 %v1632_v60 }
  0x9c   :  { %1012 = vmatmul.mubr.f32.vlgmr.msra.gmra.mrb[0].mxu1 %v1602_v52  ;;  %1117 = vmatmul.mubr.f32.vlgmr.msra.gmra.mrb[0].mxu0 %v1574_v40 }
 0x16f   :  { %v1013_v23 = vpop.f32.mrb[0].mxu1  ;;  %v1118_v34 = vpop.f32.mrb[0].mxu0 }
 0x170   :  { %v1311_v45 = vadd.f32 %v1118_v34, %v1013_v23  ;;  %v445_v46 = vpop.f32.mrb[1].mxu1  ;;  %v761_v49 = vpop.f32.mrb[1].mxu0 }
 0x171   :  { %v1312_v55 = vadd.f32 %v761_v49, %v445_v46 }
 0x172   :  { %v772_v53 = vadd.f32 %v1311_v45, %v800_v25 }
 0x173   :  { %v771_v59 = vadd.f32 %v1312_v55, %v800_v25 }
 0x174   :  { %781 = vst [vmem:[#allocation9 + $0x8] sm:$0xff] %v772_v53 }
 0x175   :  { %780 = vst [vmem:[#allocation9] sm:$0xff] %v771_v59 }
 0x176   :  { %1404 = shalt.err (!%p1401_p0)
}
 0x177   :  { %s1405_s28 = scalar_lea.hbm %s1780_s3, 256 }
 0x178   :  { %p1406_p1 = scmp.ne.s32.totalorder %s1780_s3, %s1405_s28  ;;  %p1409_p2 = scmp.lt.u32.totalorder %s1405_s28, %s1780_s3 }
 0x17a   :  { %p1411_p3 = pnand %p1409_p2, %p1406_p1 }
 0x17c   :  { %1414 = shalt.err (!%p1411_p3)
}
 0x17d   :  { %793 = dma.vmem_to_hbm [thread:$0]  %s788_s22, 256, %s1780_s3, [#allocation5], %s1423_s24, %s1423_s24, %s1424_s25  }
 0x17e   :  { %1419 = dma.done.wait [#allocation5], 256  }
 0x17f   :  { %1420 = vsyncadd [#allocation5], 4294967040 }
 0x180   :  { %797 = vsyncpa [#allocation4], 1 }
 0x181   :  { %798 = vsyncpa [#allocation7], 1 }
 0x182   :  { %799 = vsyncpa [#allocation5], 1 }

</bundles_post_ra>
